<compile_context>
chip_gen: v7x
topology: tpu7x:2x2x1
jax: 0.10.0
libtpu: 0.0.40
codegen_flags: <defaults>
</compile_context>

<pallas_src>
import jax
import jax.numpy as jnp
from jax import lax
from jax.experimental import pallas as pl
from jax.experimental.pallas import tpu as pltpu

K_SIZE = 4
STRIDE = 2
PADDING = 1
BN_EPS = 1e-5


def _round_up(x, m):
    return (x + m - 1) // m * m


def _vmem_budget():
    """Per-generation (tile budget, scoped vmem_limit) in bytes."""
    cap = None
    try:
        info = pltpu.get_tpu_info()
        for name in ("vmem_capacity_bytes", "vmem_bytes", "vmem_size_bytes"):
            cap = getattr(info, name, None)
            if cap:
                break
    except Exception:
        cap = None
    if cap is not None and cap >= 100 * 1024 * 1024:
        # v5e / v6e: 128 MiB physical VMEM -> let tiles grow (fewer grid steps).
        return 48 * 1024 * 1024, 64 * 1024 * 1024
    # v7x (64 MiB physical, 32 MiB scoped default) or unknown: stay conservative.
    return 20 * 1024 * 1024, 32 * 1024 * 1024


# ---------------------------------------------------------------------------
# Single Pallas pass: conv-as-matmul (bf16 in, f32 acc) + per-tile BN sums,
# conv tile written back in bf16.
# ---------------------------------------------------------------------------
def _conv_stats_kernel(w_ref, p_ref, conv_ref, st_ref):
    # w_ref:    (1, Co_p, CiKK_p)  bf16
    # p_ref:    (1, CiKK_p, TM)    bf16
    # conv_ref: (1, Co_p, TM)      bf16  (raw conv, lane-dense, halved writeback)
    # st_ref:   (1, 2, Co_p, 1)    f32   (row 0: sum over TM, row 1: sum of squares)
    conv = jnp.dot(w_ref[0], p_ref[0], preferred_element_type=jnp.float32)  # (Co_p, TM)
    # BN partial sums come from the f32 MXU accumulator, BEFORE the bf16 downcast.
    st_ref[0, 0] = jnp.sum(conv, axis=1, keepdims=True)
    st_ref[0, 1] = jnp.sum(conv * conv, axis=1, keepdims=True)
    conv_ref[0] = conv.astype(conv_ref.dtype)


# ---------------------------------------------------------------------------
# JAX glue: sub-pixel phase decomposition (no zero-insertion, no 75% zeros),
# built directly in bf16.
# ---------------------------------------------------------------------------
def _subpixel_phase_data(x, w, co_p, cikk_p):
    """ConvTranspose2d(k=4, s=2, p=1) == 4 dense 2x2 convs, one per output parity.

    Returns:
      patches_t: (4, cikk_p, N*H*W)  bf16, row order (ci, dy, dx); zero-padded rows.
      w_t:       (4, co_p, cikk_p)   bf16, matching column order; zero-padded.
    Phase ph = py*2 + px produces output pixels (2y+py, 2x+px).
    """
    n, ci, h, wd = x.shape
    _, co, k, _ = w.shape
    assert k == K_SIZE
    # Cast once BEFORE the 16 shifted slices / stack / transpose so the XLA prep
    # pass moves bf16 (not a materialized f32 im2col that is cast afterwards).
    xp = jnp.pad(x, ((0, 0), (0, 0), (1, 1), (1, 1))).astype(jnp.bfloat16)
    wb = w.astype(jnp.bfloat16)
    m = n * h * wd
    patches, weights = [], []
    for py in range(2):
        for px in range(2):
            taps = []
            for dy in range(2):
                for dx in range(2):
                    taps.append(xp[:, :, py + dy:py + dy + h, px + dx:px + dx + wd])
            t = jnp.stack(taps, axis=2)                    # (N, Ci, 4, H, W)
            t = t.transpose(1, 2, 0, 3, 4).reshape(ci * 4, m)
            patches.append(t)
            # Tap (dy, dx) of phase (py, px) uses kernel tap (ky, kx):
            ky = jnp.array([3, 1] if py == 0 else [2, 0])
            kx = jnp.array([3, 1] if px == 0 else [2, 0])
            wsel = wb[:, :, ky, :][:, :, :, kx]            # (Ci, Co, 2, 2)
            weights.append(wsel.transpose(1, 0, 2, 3).reshape(co, ci * 4))
    patches_t = jnp.stack(patches, axis=0)                 # (4, Ci*4, M) bf16
    w_t = jnp.stack(weights, axis=0)                       # (4, Co, Ci*4) bf16
    patches_t = jnp.pad(patches_t, ((0, 0), (0, cikk_p - ci * 4), (0, 0)))
    w_t = jnp.pad(w_t, ((0, 0), (0, co_p - co), (0, cikk_p - ci * 4)))
    return patches_t, w_t


def _g_block_forward(x, w_convt, gamma, beta, *, tm=None):
    """x: (N, Ci, H, W) f32; w_convt: (Ci, Co, 4, 4) (PyTorch ConvTranspose2d layout)."""
    n, ci, h, wd = x.shape
    ci_w, co, k, _ = w_convt.shape
    assert ci_w == ci and k == K_SIZE
    oh, ow = STRIDE * h, STRIDE * wd
    m_phase = n * h * wd                     # output pixels per sub-pixel phase
    m_true = n * oh * ow                     # true BN element count (= 4 * m_phase)
    co_p = _round_up(co, 8)                  # sublane-aligned channel dim
    cikk_p = _round_up(ci * 4, 16)           # bf16-tile-aligned contraction dim

    patches_t, w_t = _subpixel_phase_data(x, w_convt, co_p, cikk_p)

    budget, vmem_limit = _vmem_budget()

    # ---- M tiling, sized against the per-generation VMEM budget ----
    if tm is None:
        tm = 2048
    tm = max(128, (min(tm, _round_up(m_phase, 128)) // 128) * 128)

    def _vmem_need(t):  # double-buffered inputs/outputs of the single pass
        return 2 * (t * cikk_p * 2         # patches tile (bf16)
                    + co_p * cikk_p * 2    # weight tile (bf16)
                    + co_p * t * 2         # conv out tile (bf16)
                    + 2 * co_p * 4)        # stats tile (f32)

    while tm > 128 and _vmem_need(tm) > budget:
        tm //= 2
    tm = max(128, (tm // 128) * 128)
    grid_m = pl.cdiv(m_phase, tm)
    m_pad = grid_m * tm
    if m_pad != m_phase:
        # Zero columns contribute 0 to conv / sum / sumsq, so no masking needed.
        patches_t = jnp.pad(patches_t, ((0, 0), (0, 0), (0, m_pad - m_phase)))

    cparams = pltpu.CompilerParams(
        dimension_semantics=("parallel", "parallel"),   # 4*grid_m steps shared by TCs
        vmem_limit_bytes=vmem_limit,
    )

    flops = 2 * 4 * m_pad * cikk_p * co_p
    bytes_acc = (patches_t.size * 2 + w_t.size * 2
                 + 4 * co_p * m_pad * 2 + 4 * grid_m * 2 * co_p * 4)

    conv, stats = pl.pallas_call(
        _conv_stats_kernel,
        out_shape=[
            jax.ShapeDtypeStruct((4, co_p, m_pad), jnp.bfloat16),
            jax.ShapeDtypeStruct((4 * grid_m, 2, co_p, 1), jnp.float32),
        ],
        grid_spec=pltpu.PrefetchScalarGridSpec(
            num_scalar_prefetch=0,
            grid=(4, grid_m),
            in_specs=[
                pl.BlockSpec((1, co_p, cikk_p), lambda ph, i: (ph, 0, 0)),
                pl.BlockSpec((1, cikk_p, tm), lambda ph, i: (ph, 0, i)),
            ],
            out_specs=[
                pl.BlockSpec((1, co_p, tm), lambda ph, i: (ph, 0, i)),
                pl.BlockSpec((1, 2, co_p, 1), lambda ph, i: (ph * grid_m + i, 0, 0, 0)),
            ],
        ),
        compiler_params=cparams,
        cost_estimate=pl.CostEstimate(flops=flops, transcendentals=0,
                                      bytes_accessed=bytes_acc),
    )(w_t, patches_t)

    # ---- fold accumulated stats into per-channel scale/shift (tiny, f32) ----
    total = jnp.sum(stats[:, 0, :co, 0], axis=0)
    total_sq = jnp.sum(stats[:, 1, :co, 0], axis=0)
    mean = total / m_true
    var = jnp.maximum(total_sq / m_true - mean * mean, 0.0)   # biased (training BN)
    inv_std = lax.rsqrt(var + BN_EPS)
    scale = gamma * inv_std
    shift = beta - mean * scale

    # ---- BN + ReLU fused into the single XLA sub-pixel interleave pass ----
    # TODO(synk): the stride-2 sub-pixel interleave is not expressible as a
    # rectangular out BlockSpec, so this one layout pass (with the elementwise
    # BN/ReLU epilogue fused into it under jit) stays in XLA.
    conv_v = conv[:, :co, :m_phase].astype(jnp.float32)        # (4, Co, M)
    out = jnp.maximum(conv_v * scale[None, :, None] + shift[None, :, None], 0.0)
    out = out.reshape(2, 2, co, n, h, wd)
    out = out.transpose(3, 2, 4, 0, 5, 1).reshape(n, co, oh, ow)
    return out


g_block_forward = jax.jit(_g_block_forward, static_argnames=("tm",))


def g_block_reference(x, w_convt, gamma, beta):
    """Pure-JAX reference (XLA dilated conv), independent of the Pallas path."""
    ci, co, k, _ = w_convt.shape
    w_dir = jnp.flip(w_convt, axis=(2, 3)).transpose(1, 0, 2, 3)   # (Co, Ci, K, K)
    y = lax.conv_general_dilated(
        x, w_dir, window_strides=(1, 1),
        padding=[(k - 1 - PADDING, k - 1 - PADDING)] * 2,
        lhs_dilation=(STRIDE, STRIDE),
        dimension_numbers=("NCHW", "OIHW", "NCHW"))
    mean = y.mean(axis=(0, 2, 3), keepdims=True)
    var = y.var(axis=(0, 2, 3), keepdims=True)
    yn = (y - mean) / jnp.sqrt(var + BN_EPS)
    yn = yn * gamma.reshape(1, co, 1, 1) + beta.reshape(1, co, 1, 1)
    return jnp.maximum(yn, 0.0)


if __name__ == "__main__":
    key = jax.random.PRNGKey(0)

    def run_case(n, ci, co, h, w, tm):
        ks = jax.random.split(jax.random.fold_in(key, n * 1000 + co), 4)
        x = jax.random.normal(ks[0], (n, ci, h, w), jnp.float32)
        wt = 0.05 * jax.random.normal(ks[1], (ci, co, K_SIZE, K_SIZE), jnp.float32)
        g = 1.0 + 0.1 * jax.random.normal(ks[2], (co,), jnp.float32)
        b = 0.1 * jax.random.normal(ks[3], (co,), jnp.float32)

        out = jax.block_until_ready(g_block_forward(x, wt, g, b, tm=tm))
        assert out.shape == (n, co, 2 * h, 2 * w), out.shape

        # Tight check: reference fed the same bf16-rounded conv inputs; the only
        # extra error in the Pallas path is the bf16 rounding of the conv
        # intermediate (stats themselves come from the f32 MXU accumulator).
        xb = x.astype(jnp.bfloat16).astype(jnp.float32)
        wb = wt.astype(jnp.bfloat16).astype(jnp.float32)
        ref_t = jax.block_until_ready(g_block_reference(xb, wb, g, b))
        err_t = float(jnp.max(jnp.abs(out - ref_t)))
        assert jnp.allclose(out, ref_t, atol=2.5e-2, rtol=2.5e-2), err_t

        # Loose check against exact-f32 module semantics (bf16 matmul inputs +
        # bf16 conv intermediate are the only differences).
        ref_f = jax.block_until_ready(g_block_reference(x, wt, g, b))
        err_f = float(jnp.max(jnp.abs(out - ref_f)))
        assert err_f < 1e-1, err_f

    # Case 1: module defaults (in_channels=3), exercises M tiling (grid_m = 4).
    run_case(2, 3, 8, 16, 16, tm=128)
    # Case 2: exercises Co padding (5 -> 8), M padding (100 -> 128), auto tile size.
    run_case(1, 3, 5, 10, 10, tm=None)

    print("KERNEL_OK")
</pallas_src>

<mosaic_0001>
module attributes {stable_mosaic.version = 11 : i64} {
  func.func @_conv_stats_kernel(%arg0: i32, %arg1: i32, %arg2: memref<1x8x16xbf16, #tpu.memory_space<vmem>>, %arg3: memref<1x16x128xbf16, #tpu.memory_space<vmem>>, %arg4: memref<1x8x128xbf16, #tpu.memory_space<vmem>>, %arg5: memref<1x2x8x1xf32, #tpu.memory_space<vmem>>) attributes {dimension_semantics = [#tpu.dimension_semantics<parallel>, #tpu.dimension_semantics<parallel>], iteration_bounds = array<i64: 4, 4>, scalar_prefetch = 0 : i64, scratch_operands = 0 : i64, tpu.core_type = #tpu.core_type<tc>, window_params = [{transform_indices = @transform_0, window_bounds = array<i64: 1, 8, 16>}, {transform_indices = @transform_1, window_bounds = array<i64: 1, 16, 128>}, {transform_indices = @transform_2, window_bounds = array<i64: 1, 8, 128>}, {transform_indices = @transform_3, window_bounds = array<i64: 1, 2, 8, 1>}]} {
    %c0 = arith.constant 0 : index
    %c0_0 = arith.constant 0 : index
    %c0_1 = arith.constant 0 : index
    %0 = vector.load %arg2[%c0, %c0_0, %c0_1] : memref<1x8x16xbf16, #tpu.memory_space<vmem>>, vector<1x8x16xbf16>
    %1 = vector.shape_cast %0 : vector<1x8x16xbf16> to vector<8x16xbf16>
    %c0_2 = arith.constant 0 : index
    %c0_3 = arith.constant 0 : index
    %c0_4 = arith.constant 0 : index
    %2 = vector.load %arg3[%c0_2, %c0_3, %c0_4] : memref<1x16x128xbf16, #tpu.memory_space<vmem>>, vector<1x16x128xbf16>
    %3 = vector.shape_cast %2 : vector<1x16x128xbf16> to vector<16x128xbf16>
    %cst = arith.constant dense<0.000000e+00> : vector<8x128xf32>
    %4 = tpu.matmul %1, %3, %cst {dimension_numbers = #tpu.dot_dimension_numbers<[1], [0], [0], [1], [0, 0, 1, 1], [], []>} : vector<8x16xbf16>, vector<16x128xbf16>, vector<8x128xf32> -> vector<8x128xf32>
    %cst_5 = arith.constant dense<0.000000e+00> : vector<8xf32>
    %5 = vector.multi_reduction <add>, %4, %cst_5 [1] : vector<8x128xf32> to vector<8xf32>
    %6 = vector.shape_cast %5 : vector<8xf32> to vector<8x1xf32>
    %c0_6 = arith.constant 0 : index
    %c0_7 = arith.constant 0 : index
    %c0_8 = arith.constant 0 : index
    %c0_9 = arith.constant 0 : index
    %7 = vector.load %arg5[%c0_6, %c0_7, %c0_8, %c0_9] : memref<1x2x8x1xf32, #tpu.memory_space<vmem>>, vector<1x1x8x1xf32>
    %8 = vector.shape_cast %7 : vector<1x1x8x1xf32> to vector<8x1xf32>
    %9 = vector.shape_cast %6 : vector<8x1xf32> to vector<1x1x8x1xf32>
    tpu.vector_store %arg5[%c0_6, %c0_7, %c0_8, %c0_9], %9 {strides = array<i32>} : memref<1x2x8x1xf32, #tpu.memory_space<vmem>>, vector<1x1x8x1xf32>,
    %10 = arith.mulf %4, %4 : vector<8x128xf32>
    %cst_10 = arith.constant dense<0.000000e+00> : vector<8xf32>
    %11 = vector.multi_reduction <add>, %10, %cst_10 [1] : vector<8x128xf32> to vector<8xf32>
    %12 = vector.shape_cast %11 : vector<8xf32> to vector<8x1xf32>
    %c0_11 = arith.constant 0 : index
    %c1 = arith.constant 1 : index
    %c0_12 = arith.constant 0 : index
    %c0_13 = arith.constant 0 : index
    %13 = vector.load %arg5[%c0_11, %c1, %c0_12, %c0_13] : memref<1x2x8x1xf32, #tpu.memory_space<vmem>>, vector<1x1x8x1xf32>
    %14 = vector.shape_cast %13 : vector<1x1x8x1xf32> to vector<8x1xf32>
    %15 = vector.shape_cast %12 : vector<8x1xf32> to vector<1x1x8x1xf32>
    tpu.vector_store %arg5[%c0_11, %c1, %c0_12, %c0_13], %15 {strides = array<i32>} : memref<1x2x8x1xf32, #tpu.memory_space<vmem>>, vector<1x1x8x1xf32>,
    %16 = arith.truncf %4 : vector<8x128xf32> to vector<8x128xbf16>
    %c0_14 = arith.constant 0 : index
    %c0_15 = arith.constant 0 : index
    %c0_16 = arith.constant 0 : index
    %17 = vector.load %arg4[%c0_14, %c0_15, %c0_16] : memref<1x8x128xbf16, #tpu.memory_space<vmem>>, vector<1x8x128xbf16>
    %18 = vector.shape_cast %17 : vector<1x8x128xbf16> to vector<8x128xbf16>
    %19 = vector.shape_cast %16 : vector<8x128xbf16> to vector<1x8x128xbf16>
    tpu.vector_store %arg4[%c0_14, %c0_15, %c0_16], %19 {strides = array<i32>} : memref<1x8x128xbf16, #tpu.memory_space<vmem>>, vector<1x8x128xbf16>,
    return
  }
  func.func @transform_0(%arg0: i32, %arg1: i32) -> (i32, i32, i32) {
    %c0_i32 = arith.constant 0 : i32
    %c0_i32_0 = arith.constant 0 : i32
    %c0_i32_1 = arith.constant 0 : i32
    return %arg0, %c0_i32, %c0_i32_0 : i32, i32, i32
  }
  func.func @transform_1(%arg0: i32, %arg1: i32) -> (i32, i32, i32) {
    %c0_i32 = arith.constant 0 : i32
    %c0_i32_0 = arith.constant 0 : i32
    return %arg0, %c0_i32, %arg1 : i32, i32, i32
  }
  func.func @transform_2(%arg0: i32, %arg1: i32) -> (i32, i32, i32) {
    %c0_i32 = arith.constant 0 : i32
    %c0_i32_0 = arith.constant 0 : i32
    return %arg0, %c0_i32, %arg1 : i32, i32, i32
  }
  func.func @transform_3(%arg0: i32, %arg1: i32) -> (i32, i32, i32, i32) {
    %c4_i32 = arith.constant 4 : i32
    %0 = arith.muli %arg0, %c4_i32 : i32
    %1 = arith.addi %0, %arg1 : i32
    %c0_i32 = arith.constant 0 : i32
    %c0_i32_0 = arith.constant 0 : i32
    %c0_i32_1 = arith.constant 0 : i32
    %c0_i32_2 = arith.constant 0 : i32
    return %1, %c0_i32, %c0_i32_0, %c0_i32_1 : i32, i32, i32, i32
  }
}

</mosaic_0001>

<bundles_post_ra>
// kernel: _g_block_forward.1
= control target key start
LH: loop header
LB: loop body
LE: loop exit
PB: predicated region body
PF: predicated region fallthrough
CT: control target
= control target key end

     0   :  { %s653_s12 = smov 0   ;;  %s655_s13 = smov 0   ;;  %s752_s0 = inlined_call_operand.vmem [shape: bf16[4,8,16], index: 0, kind: input, shape index: {}]   ;;  %s753_s1 = inlined_call_operand.vmem [shape: bf16[4,16,512], index: 1, kind: input, shape index: {}]   ;;  %s754_s2 = inlined_call_operand.vmem [shape: bf16[4,8,512], index: 2, kind: output, shape index: {0}]   ;;  %s755_s3 = inlined_call_operand.vmem [shape: f32[16,2,8,1], index: 3, kind: output, shape index: {1}]  }
   0x1   :  { %s657_s14 = smov 0   ;;  %s659_s15 = smov 0  }
   0x2   :  { %s661_s16 = smov 0   ;;  %s663_s17 = smov 0  }
   0x3   :  { %s665_s18 = smov 0  }
   0x4 LB: > { %s23_s19 = sadd.s32 1, %s621_s16  ;;  %s26_s20 = sadd.s32 1, %s625_s17  ;;  %s629_s18 = sphi %s665_s18, %s14_s18   ;;  %s625_s17 = sphi %s663_s17, %s761_s17   ;;  %s621_s16 = sphi %s661_s16, %s760_s16   ;;  %s617_s15 = sphi %s659_s15, %s759_s15   ;;  %s613_s14 = sphi %s657_s14, %s758_s14   ;;  %s609_s13 = sphi %s655_s13, %s757_s13   ;;  %s605_s12 = sphi %s653_s12, %s756_s12  }
   0x5   : > { %p24_p0 = scmp.ge.s32.totalorder %s23_s19, 4  ;;  %p68_p1 = scmp.ne.s32.totalorder %s609_s13, %s605_s12 }
   0x6   : > { %p69_p2 = scmp.eq.s32.totalorder %s629_s18, 0  ;;  %s61_s24 = sadd.s32 1, %s609_s13 }
   0x7   : > { %s763_s19 = smov (%p24_p0, %s23_s19), 0  ;;  %s765_s20 = smov (!%p24_p0, %s26_s20), %s625_s17 }
   0x8   : > { %p70_p3 = por %p69_p2, %p68_p1  ;;  %p28_p4 = scmp.ge.s32.totalorder %s765_s20, 4 }
   0x9   : > { %s57_s21 = ssub.s32 %s621_s16, %s763_s19  ;;  %p490_p6 = scmp.ge.s32.totalorder %s629_s18, 16 }
   0xa   : > { %s767_s20 = smov (%p28_p4, %s765_s20), 0 }
   0xb   : > { %s56_s22 = ssub.s32 %s625_s17, %s767_s20  ;;  %152 = sbr.rel (%p490_p6) target bundleno = 25 (0x19), region = 16 }
   0xc   : > { %s58_s23 = sor.u32 %s57_s21, %s56_s22 }
   0xd   : > { %p59_p5 = scmp.eq.s32.totalorder %s58_s23, 0 }
   0xf   : > { %s704_s25 = scalar_select %p59_p5, %s609_s13, %s61_s24  }
  0x12   : > { %162 = sbr.rel (!%p70_p3) target bundleno = 25 (0x19), region = 24  ;;  %s164_s26 = sand.u32 (%p70_p3), 1, %s609_s13  }
  0x13   : > { %s492_s27 = sshll.u32 (%p70_p3), %s625_s17, 3  ;;  %s491_s28 = sshll.u32 (%p70_p3), %s164_s26, 3 }
  0x14   : > { %s168_s29 = sadd.s32 (%p70_p3), %s621_s16, %s492_s27  ;;  %s166_s7 = scalar_lea.vmem (%p70_p3), [#allocation2], %s491_s28 }
  0x15   : > { %s493_s30 = sshll.u32 (%p70_p3), %s168_s29, 2 }
  0x16   : > { %s170_s6 = scalar_lea.vmem (%p70_p3), %s753_s1, %s493_s30 }
  0x17   : > { %v186_v0 = vld [vmem:[%s170_s6] sm:$0xf] (%p70_p3)  ;;  %v188_v1 = vld [vmem:[%s170_s6 + $0x10] sm:$0xf] (%p70_p3) }
  0x18   : > { %187 = vst [vmem:[%s166_s7] sm:$0xf] (%p70_p3), %v186_v0  ;;  %189 = vst [vmem:[%s166_s7 + $0x4] sm:$0xf] (%p70_p3), %v188_v1 }
  0x19 PF: > { %p494_p7 = scmp.ge.s32.totalorder %s629_s18, 1  ;;  %p215_p8 = scmp.lt.s32.totalorder %s629_s18, 17 }
  0x1b   : > { %p216_p9 = pnand %p494_p7, %p215_p8 }
  0x1c   : > { %s222_s8 = sand.u32 (!%p216_p9), 1, %s605_s12   ;;  %p259_p10 = scmp.lt.s32.totalorder (!%p216_p9), %s617_s15, 3  ;;  %v631_v2 = vmov (!%p216_p9), 0.0   ;;  %vm632_vm0 = vmmov (!%p216_p9), 0   ;;  %vm290_vm1 = vcmask (!%p216_p9), 130048   ;;  %vm336_vm2 = vcmask (!%p216_p9), 7168  }
  0x1d   : > { %219 = sbr.rel (%p216_p9) target bundleno = 400 (0x190), region = 65  ;;  %510 = vmatprep.subr.bf16.mxu0 (!%p216_p9), %v631_v2  ;;  %s495_s9 = sshll.u32 (!%p216_p9), %s222_s8, 3  ;;  %512 = vmatprep.mubr.msk.bf16.mxu0 (!%p216_p9), %vm632_vm0, %v631_v2 }
  0x1e   : > { %s224_s10 = scalar_lea.vmem (!%p216_p9), [#allocation2], %s495_s9  ;;  %p265_p11 = scmp.lt.s32.totalorder (!%p216_p9), %s613_s14, 3 }
  0x1f   : > { %v574_v3 = vld [vmem:[%s224_s10] sm:$0xff] (!%p216_p9)   ;;  %s499_s4 = sshll.u32 (!%p216_p9), %s617_s15, 2 }
  0x20   : > { %511 = vmatpush3.bf16.msra.mxu0 (!%p216_p9), %v574_v3  ;;  %s272_s5 = sadd.s32 (!%p216_p9), %s613_s14, %s499_s4 }
  0x21   : > { %p273_p12 = scmp.lt.s32.totalorder (!%p216_p9), %s272_s5, 15 }
  0x24   : > { %s260_s11 = scalar_select %p259_p10, %s617_s15, 3 }
  0x25   : > { %s266_s12 = scalar_select %p265_p11, %s613_s14, 3 }
  0x26   : > { %s496_s21 = sshll.u32 %s260_s11, 2  ;;  %s769_s5 = smov (!%p273_p12, %s272_s5), 15 }
  0x27   : > { %s262_s24 = scalar_lea.vmem %s752_s0, %s496_s21  ;;  %s268_s26 = sadd.s32 %s496_s21, %s266_s12 }
  0x28   : > { %v281_v4 = vld [vmem:[%s262_s24] sm:$0xf]  ;;  %s498_s27 = sshll.u32 %s268_s26, 2  ;;  %s507_s6 = sshll.u32 %s769_s5, 4 }
  0x29   : > { %513 = vmatmul.mubr.msk.bf16.vlgmr.msra.gmra.mrb[0].mxu0 %vm290_vm1, %v281_v4  ;;  %s270_s30 = scalar_lea.vmem %s754_s2, %s498_s27  ;;  %s277_s9 = scalar_lea.vmem %s755_s3, %s507_s6 }
  0xfc   : > { %v328_v5 = vpop.f32.mrb[0].mxu0 }
  0xfd   : > { %v343_v6 = vpack.c.bf16 %v328_v5, %v328_v5  ;;  %334 = vadd.xlane.f32.xlu0 %v328_v5  ;;  %v514_v7 = vpop.f32.mrb[1].mxu0  ;;  %v338_v10 = vmul.f32 %v328_v5, %v328_v5 }
  0xfe   : > { %v331_v8 = vpop.f32.mrb[2].mxu0 }
  0xff   : > { %344 = vst [vmem:[%s270_s30] sm:$0xf] %v343_v6  ;;  %v515_v9 = vpop.f32.mrb[3].mxu0 }
 0x101   : > { %339 = vadd.xlane.f32.xlu0 %v338_v10 }
 0x18a   : > { %v335_v11 = vpop.xlane.xlu0 %334 }
 0x18b   : > { %337 = vst.msk [vmem:[%s277_s9] sm:$0xff] %vm336_vm2, %v335_v11 }
 0x18e   : > { %v340_v12 = vpop.xlane.xlu0 %339 }
 0x18f   : > { %504 = vst.msk [vmem:[%s277_s9 + $0x8] sm:$0xff] %vm336_vm2, %v340_v12 }
 0x190 PF: > { %s14_s18 = sadd.s32 1, %s629_s18   ;;  %s756_s12 = smov %s609_s13 }
 0x191   : > { %p11_p13 = scmp.ge.s32.totalorder %s14_s18, 18   ;;  %s757_s13 = smov %s704_s25 }
 0x192   : > { %s758_s14 = smov %s621_s16  ;;  %s759_s15 = smov %s625_s17 }
 0x193   : > { %s760_s16 = smov %s763_s19  ;;  %s761_s17 = smov %s767_s20 }
 0x194   :  { %13 = sbr.rel (!%p11_p13) target bundleno = 4 (0x4), region = 120 }

</bundles_post_ra>
